<compile_context>
chip_gen: v5e
topology: v5e:2x2
jax: 0.10.0
libtpu: 0.0.40
codegen_flags: <defaults>
</compile_context>

<pallas_src>
import functools

import numpy as np
import jax
import jax.numpy as jnp
from jax.experimental import pallas as pl
from jax.experimental.pallas import tpu as pltpu


# ----------------------------------------------------------------------------
# Single fused kernel: q_sample + model surrogate + eps-loss + predict_x0 +
# refinement surrogate + all scalar losses + finalize.
# ----------------------------------------------------------------------------
def _fused_trainer_kernel(
    visir_ref,    # (2*B*C, HW)  rows: [vis (B*C) ; ir (B*C)]
    xs_ref,       # (B*C, HW)    x_start ('fusion')
    nz_ref,       # (B*C, HW)    noise
    masks_ref,    # (2, HW)      row 0: h>=1 mask, row 1: w>=1 mask
    wm_vi_ref,    # (B*C, 2*B*C) block-diag [wmv | wmi]
    wm_x_ref,     # (B*C, B*C)   block-diag wmx
    mean_ref,     # (B*C, B*C)   block 1/C (channel mean + re-broadcast)
    wr_vi_ref,    # (B*C, 2*B*C) block-diag [wrv | wri]
    wr_x_ref,     # (B*C, B*C)   block-diag wrx
    a_ref, b_ref, ra_ref, rb_ref,   # (B*C, 1) gathered diffusion coefficients
    tm_ref, tr_ref,                  # (B*C, 1) time embeddings
    loss_ref,     # (B*C, HW)    output: final per-pixel loss
    *, width):
  bc, hw = xs_ref.shape
  height = hw // width

  visir = visir_ref[...]
  vis = visir[:bc]
  ir = visir[bc:]
  xs = xs_ref[...]
  nz = nz_ref[...]

  # q_sample: x_t = sqrt(alpha_bar_t) * x_0 + sqrt(1 - alpha_bar_t) * noise
  x_t = a_ref[...] * xs + b_ref[...] * nz

  # "model" surrogate (per-batch 1x1 conv over cat([vis, ir, x_t], 1) + time
  # embedding), then pred_noise = model(...).mean(dim=1, keepdim=True).
  y = (jnp.dot(wm_vi_ref[...], visir, preferred_element_type=jnp.float32)
       + jnp.dot(wm_x_ref[...], x_t, preferred_element_type=jnp.float32)
       + tm_ref[...])
  pred_noise = jnp.dot(mean_ref[...], y, preferred_element_type=jnp.float32)

  # loss_eps = 8 * F.mse_loss(pred_noise, noise, reduction='none') (broadcast)
  loss_eps = 8.0 * (pred_noise - nz) ** 2

  # predict_start_from_noise at (t - 1), clamped to [-1, 1]
  pred_x0 = jnp.clip(ra_ref[...] * x_t - rb_ref[...] * pred_noise, -1.0, 1.0)

  # "refinement_fn" surrogate over cat([vis, ir], 1), pred_x0, t ; clamped.
  ry = (jnp.dot(wr_vi_ref[...], visir, preferred_element_type=jnp.float32)
        + jnp.dot(wr_x_ref[...], pred_x0, preferred_element_type=jnp.float32)
        + tr_ref[...])
  refine = jnp.clip(ry, -1.0, 1.0)

  # --- scalar losses (reduced over the whole batch) ---
  max_img = jnp.maximum(vis, ir)
  loss_max = 4.0 * jnp.mean((refine - max_img) ** 2)
  loss_x0 = 2.0 * jnp.mean((refine - xs) ** 2)

  # TODO(synk): Grad_loss / SSIM_loss classes are not given in the reference
  # source; below are fusion-style stand-ins (joint max-gradient L1 via
  # lane rolls, global-statistics SSIM per (batch, channel) image).
  masks = masks_ref[...]
  mask_h = masks[0:1, :]     # valid where h >= 1
  mask_w = masks[1:2, :]     # valid where w >= 1

  def grad_h(x):  # backward difference along H (rows of the flattened image)
    return x - pltpu.roll(x, shift=width, axis=1)

  def grad_w(x):  # backward difference along W
    return x - pltpu.roll(x, shift=1, axis=1)

  jh = jnp.maximum(jnp.abs(grad_h(vis)), jnp.abs(grad_h(ir)))
  jw = jnp.maximum(jnp.abs(grad_w(vis)), jnp.abs(grad_w(ir)))
  n_h = float(bc * (height - 1) * width)
  n_w = float(bc * height * (width - 1))
  loss_grad = 5.0 * (
      jnp.sum(jnp.abs(jnp.abs(grad_h(refine)) - jh) * mask_h) / n_h
      + jnp.sum(jnp.abs(jnp.abs(grad_w(refine)) - jw) * mask_w) / n_w)

  inv_hw = 1.0 / float(hw)

  def ssim_loss(x, y):
    c1 = 0.01 ** 2
    c2 = 0.03 ** 2
    mx = jnp.sum(x, axis=1, keepdims=True) * inv_hw     # per-(b,c) image stats
    my = jnp.sum(y, axis=1, keepdims=True) * inv_hw
    xc = x - mx
    yc = y - my
    vx = jnp.sum(xc * xc, axis=1, keepdims=True) * inv_hw
    vy = jnp.sum(yc * yc, axis=1, keepdims=True) * inv_hw
    cxy = jnp.sum(xc * yc, axis=1, keepdims=True) * inv_hw
    ssim = ((2.0 * mx * my + c1) * (2.0 * cxy + c2)) / (
        (mx * mx + my * my + c1) * (vx + vy + c2))
    return 1.0 - jnp.mean(ssim)

  loss_ssim = ssim_loss(refine, vis) + ssim_loss(refine, ir)

  scalar_losses = loss_max + loss_grad + loss_ssim + loss_x0
  # final: loss = (loss_eps + loss_x0 + loss_simple) / 20
  loss_ref[...] = (loss_eps + scalar_losses) * (1.0 / 20.0)


# ----------------------------------------------------------------------------
# Parameter / buffer setup (deterministic, in-script).
# ----------------------------------------------------------------------------
def make_trainer(beta_1, beta_T, T, C, weight_key):
  betas = np.linspace(beta_1, beta_T, T, dtype=np.float64)
  alphas = 1.0 - betas
  alphas_bar = np.cumprod(alphas)
  buffers = dict(
      sqrt_alphas_bar=jnp.asarray(np.sqrt(alphas_bar), jnp.float32),
      sqrt_one_minus_alphas_bar=jnp.asarray(np.sqrt(1.0 - alphas_bar),
                                            jnp.float32),
      sqrt_recip_alphas_bar=jnp.asarray(np.sqrt(1.0 / alphas_bar),
                                        jnp.float32),
      sqrt_recipm1_alphas_bar=jnp.asarray(np.sqrt(1.0 / alphas_bar - 1.0),
                                          jnp.float32),
  )
  ks = jax.random.split(weight_key, 8)
  params = dict(
      wmv=0.1 * jax.random.normal(ks[0], (C, C), jnp.float32),
      wmi=0.1 * jax.random.normal(ks[1], (C, C), jnp.float32),
      wmx=0.1 * jax.random.normal(ks[2], (C, C), jnp.float32),
      emb_m=0.1 * jax.random.normal(ks[3], (C,), jnp.float32),
      wrv=0.1 * jax.random.normal(ks[4], (C, C), jnp.float32),
      wri=0.1 * jax.random.normal(ks[5], (C, C), jnp.float32),
      wrx=0.1 * jax.random.normal(ks[6], (C, C), jnp.float32),
      emb_r=0.1 * jax.random.normal(ks[7], (C,), jnp.float32),
  )
  return buffers, params


# ----------------------------------------------------------------------------
# Forward pass: glue (gathers, layout prep, block-diag weights) + one kernel.
# ----------------------------------------------------------------------------
def trainer_forward(buffers, params, x_0, key, T):
  x_start = x_0['fusion'].astype(jnp.float32)
  vis = x_0['vis'].astype(jnp.float32)
  ir = x_0['ir'].astype(jnp.float32)
  B, C, H, W = vis.shape
  HW = H * W
  BC = B * C

  k_t, k_n = jax.random.split(key)
  t = jax.random.randint(k_t, (B,), 1, T)                       # torch.randint(1, T)
  noise = jax.random.normal(k_n, x_start.shape, jnp.float32)    # randn_like

  # extract(...): gather coefficients at t (and t-1), one value per (b, c) row.
  def per_row(v):
    return jnp.repeat(v, C).reshape(BC, 1).astype(jnp.float32)

  coef_a = per_row(buffers['sqrt_alphas_bar'][t])
  coef_b = per_row(buffers['sqrt_one_minus_alphas_bar'][t])
  coef_ra = per_row(buffers['sqrt_recip_alphas_bar'][t - 1])
  coef_rb = per_row(buffers['sqrt_recipm1_alphas_bar'][t - 1])

  t_norm = t.astype(jnp.float32) / float(T)
  temb_m = (t_norm[:, None] * params['emb_m'][None, :]).reshape(BC, 1)
  temb_r = (t_norm[:, None] * params['emb_r'][None, :]).reshape(BC, 1)

  # Block-diagonal weights: batch folded onto the sublane axis so each
  # surrogate is a single pair of dots over the whole batch.
  eye_b = jnp.eye(B, dtype=jnp.float32)
  bd = lambda w: jnp.kron(eye_b, w)
  wm_vi = jnp.concatenate([bd(params['wmv']), bd(params['wmi'])], axis=1)
  wm_x = bd(params['wmx'])
  wr_vi = jnp.concatenate([bd(params['wrv']), bd(params['wri'])], axis=1)
  wr_x = bd(params['wrx'])
  mean_mat = bd(jnp.full((C, C), 1.0 / C, jnp.float32))

  # Lane-dense (B*C, HW) layouts (exact (8,128) f32 tiles at these shapes).
  visir = jnp.concatenate([vis.reshape(BC, HW), ir.reshape(BC, HW)], axis=0)
  xs_f = x_start.reshape(BC, HW)
  nz_f = noise.reshape(BC, HW)

  # Boundary masks for the roll-based finite-difference gradient loss.
  col = jnp.arange(HW, dtype=jnp.int32)
  masks = jnp.stack([(col >= W).astype(jnp.float32),
                     ((col % W) != 0).astype(jnp.float32)], axis=0)

  vmem = pl.BlockSpec(memory_space=pltpu.MemorySpace.VMEM)
  kernel = functools.partial(_fused_trainer_kernel, width=W)

  loss_f = pl.pallas_call(
      kernel,
      out_shape=jax.ShapeDtypeStruct((BC, HW), jnp.float32),
      in_specs=[vmem] * 15,
      out_specs=vmem,
  )(visir, xs_f, nz_f, masks,
    wm_vi, wm_x, mean_mat, wr_vi, wr_x,
    coef_a, coef_b, coef_ra, coef_rb, temb_m, temb_r)

  return loss_f.reshape(B, C, H, W)


if __name__ == "__main__":
  B, C, H, W = 2, 4, 16, 16
  T = 100
  beta_1, beta_T = 1e-4, 0.02

  key = jax.random.PRNGKey(0)
  k_vis, k_ir, k_fus, k_fwd = jax.random.split(key, 4)
  x_0 = {
      'vis': jnp.clip(jax.random.normal(k_vis, (B, C, H, W), jnp.float32),
                      -1.0, 1.0),
      'ir': jnp.clip(jax.random.normal(k_ir, (B, C, H, W), jnp.float32),
                     -1.0, 1.0),
      'fusion': jnp.clip(jax.random.normal(k_fus, (B, C, H, W), jnp.float32),
                         -1.0, 1.0),
  }

  buffers, params = make_trainer(beta_1, beta_T, T, C, jax.random.PRNGKey(1))
  loss = trainer_forward(buffers, params, x_0, k_fwd, T)
  loss = jax.block_until_ready(loss)
  assert loss.shape == (B, C, H, W)
  assert bool(jnp.all(jnp.isfinite(loss)))
  print("KERNEL_OK")
</pallas_src>

<mosaic_0001>
module attributes {stable_mosaic.version = 11 : i64} {
  func.func @_fused_trainer_kernel(%arg0: memref<16x256xf32, #tpu.memory_space<vmem>>, %arg1: memref<8x256xf32, #tpu.memory_space<vmem>>, %arg2: memref<8x256xf32, #tpu.memory_space<vmem>>, %arg3: memref<2x256xf32, #tpu.memory_space<vmem>>, %arg4: memref<8x16xf32, #tpu.memory_space<vmem>>, %arg5: memref<8x8xf32, #tpu.memory_space<vmem>>, %arg6: memref<8x8xf32, #tpu.memory_space<vmem>>, %arg7: memref<8x16xf32, #tpu.memory_space<vmem>>, %arg8: memref<8x8xf32, #tpu.memory_space<vmem>>, %arg9: memref<8x1xf32, #tpu.memory_space<vmem>>, %arg10: memref<8x1xf32, #tpu.memory_space<vmem>>, %arg11: memref<8x1xf32, #tpu.memory_space<vmem>>, %arg12: memref<8x1xf32, #tpu.memory_space<vmem>>, %arg13: memref<8x1xf32, #tpu.memory_space<vmem>>, %arg14: memref<8x1xf32, #tpu.memory_space<vmem>>, %arg15: memref<8x256xf32, #tpu.memory_space<vmem>>) attributes {dimension_semantics = [], scalar_prefetch = 0 : i64, scratch_operands = 0 : i64, tpu.core_type = #tpu.core_type<tc>} {
    %c0 = arith.constant 0 : index
    %c0_0 = arith.constant 0 : index
    %0 = vector.load %arg0[%c0, %c0_0] : memref<16x256xf32, #tpu.memory_space<vmem>>, vector<16x256xf32>
    %1 = vector.extract_strided_slice %0 {offsets = [0, 0], sizes = [8, 256], strides = [1, 1]} : vector<16x256xf32> to vector<8x256xf32>
    %2 = vector.extract_strided_slice %0 {offsets = [8, 0], sizes = [8, 256], strides = [1, 1]} : vector<16x256xf32> to vector<8x256xf32>
    %c0_1 = arith.constant 0 : index
    %c0_2 = arith.constant 0 : index
    %3 = vector.load %arg1[%c0_1, %c0_2] : memref<8x256xf32, #tpu.memory_space<vmem>>, vector<8x256xf32>
    %c0_3 = arith.constant 0 : index
    %c0_4 = arith.constant 0 : index
    %4 = vector.load %arg2[%c0_3, %c0_4] : memref<8x256xf32, #tpu.memory_space<vmem>>, vector<8x256xf32>
    %c0_5 = arith.constant 0 : index
    %c0_6 = arith.constant 0 : index
    %5 = vector.load %arg9[%c0_5, %c0_6] : memref<8x1xf32, #tpu.memory_space<vmem>>, vector<8x1xf32>
    %6 = vector.broadcast %5 : vector<8x1xf32> to vector<8x256xf32>
    %7 = arith.mulf %6, %3 : vector<8x256xf32>
    %c0_7 = arith.constant 0 : index
    %c0_8 = arith.constant 0 : index
    %8 = vector.load %arg10[%c0_7, %c0_8] : memref<8x1xf32, #tpu.memory_space<vmem>>, vector<8x1xf32>
    %9 = vector.broadcast %8 : vector<8x1xf32> to vector<8x256xf32>
    %10 = arith.mulf %9, %4 : vector<8x256xf32>
    %11 = arith.addf %7, %10 : vector<8x256xf32>
    %c0_9 = arith.constant 0 : index
    %c0_10 = arith.constant 0 : index
    %12 = vector.load %arg4[%c0_9, %c0_10] : memref<8x16xf32, #tpu.memory_space<vmem>>, vector<8x16xf32>
    %cst = arith.constant dense<0.000000e+00> : vector<8x256xf32>
    %13 = tpu.matmul %12, %0, %cst {dimension_numbers = #tpu.dot_dimension_numbers<[1], [0], [0], [1], [0, 0, 1, 1], [], []>} : vector<8x16xf32>, vector<16x256xf32>, vector<8x256xf32> -> vector<8x256xf32>
    %c0_11 = arith.constant 0 : index
    %c0_12 = arith.constant 0 : index
    %14 = vector.load %arg5[%c0_11, %c0_12] : memref<8x8xf32, #tpu.memory_space<vmem>>, vector<8x8xf32>
    %cst_13 = arith.constant dense<0.000000e+00> : vector<8x256xf32>
    %15 = tpu.matmul %14, %11, %cst_13 {dimension_numbers = #tpu.dot_dimension_numbers<[1], [0], [0], [1], [0, 0, 1, 1], [], []>} : vector<8x8xf32>, vector<8x256xf32>, vector<8x256xf32> -> vector<8x256xf32>
    %16 = arith.addf %13, %15 : vector<8x256xf32>
    %c0_14 = arith.constant 0 : index
    %c0_15 = arith.constant 0 : index
    %17 = vector.load %arg13[%c0_14, %c0_15] : memref<8x1xf32, #tpu.memory_space<vmem>>, vector<8x1xf32>
    %18 = vector.broadcast %17 : vector<8x1xf32> to vector<8x256xf32>
    %19 = arith.addf %16, %18 : vector<8x256xf32>
    %c0_16 = arith.constant 0 : index
    %c0_17 = arith.constant 0 : index
    %20 = vector.load %arg6[%c0_16, %c0_17] : memref<8x8xf32, #tpu.memory_space<vmem>>, vector<8x8xf32>
    %cst_18 = arith.constant dense<0.000000e+00> : vector<8x256xf32>
    %21 = tpu.matmul %20, %19, %cst_18 {dimension_numbers = #tpu.dot_dimension_numbers<[1], [0], [0], [1], [0, 0, 1, 1], [], []>} : vector<8x8xf32>, vector<8x256xf32>, vector<8x256xf32> -> vector<8x256xf32>
    %22 = arith.subf %21, %4 : vector<8x256xf32>
    %23 = arith.mulf %22, %22 : vector<8x256xf32>
    %cst_19 = arith.constant 8.000000e+00 : f32
    %24 = vector.broadcast %cst_19 : f32 to vector<8x256xf32>
    %25 = arith.mulf %24, %23 : vector<8x256xf32>
    %c0_20 = arith.constant 0 : index
    %c0_21 = arith.constant 0 : index
    %26 = vector.load %arg11[%c0_20, %c0_21] : memref<8x1xf32, #tpu.memory_space<vmem>>, vector<8x1xf32>
    %27 = vector.broadcast %26 : vector<8x1xf32> to vector<8x256xf32>
    %28 = arith.mulf %27, %11 : vector<8x256xf32>
    %c0_22 = arith.constant 0 : index
    %c0_23 = arith.constant 0 : index
    %29 = vector.load %arg12[%c0_22, %c0_23] : memref<8x1xf32, #tpu.memory_space<vmem>>, vector<8x1xf32>
    %30 = vector.broadcast %29 : vector<8x1xf32> to vector<8x256xf32>
    %31 = arith.mulf %30, %21 : vector<8x256xf32>
    %32 = arith.subf %28, %31 : vector<8x256xf32>
    %cst_24 = arith.constant -1.000000e+00 : f32
    %cst_25 = arith.constant 1.000000e+00 : f32
    %33 = vector.broadcast %cst_24 : f32 to vector<8x256xf32>
    %34 = arith.maximumf %33, %32 : vector<8x256xf32>
    %35 = vector.broadcast %cst_25 : f32 to vector<8x256xf32>
    %36 = arith.minimumf %35, %34 : vector<8x256xf32>
    %c0_26 = arith.constant 0 : index
    %c0_27 = arith.constant 0 : index
    %37 = vector.load %arg7[%c0_26, %c0_27] : memref<8x16xf32, #tpu.memory_space<vmem>>, vector<8x16xf32>
    %cst_28 = arith.constant dense<0.000000e+00> : vector<8x256xf32>
    %38 = tpu.matmul %37, %0, %cst_28 {dimension_numbers = #tpu.dot_dimension_numbers<[1], [0], [0], [1], [0, 0, 1, 1], [], []>} : vector<8x16xf32>, vector<16x256xf32>, vector<8x256xf32> -> vector<8x256xf32>
    %c0_29 = arith.constant 0 : index
    %c0_30 = arith.constant 0 : index
    %39 = vector.load %arg8[%c0_29, %c0_30] : memref<8x8xf32, #tpu.memory_space<vmem>>, vector<8x8xf32>
    %cst_31 = arith.constant dense<0.000000e+00> : vector<8x256xf32>
    %40 = tpu.matmul %39, %36, %cst_31 {dimension_numbers = #tpu.dot_dimension_numbers<[1], [0], [0], [1], [0, 0, 1, 1], [], []>} : vector<8x8xf32>, vector<8x256xf32>, vector<8x256xf32> -> vector<8x256xf32>
    %41 = arith.addf %38, %40 : vector<8x256xf32>
    %c0_32 = arith.constant 0 : index
    %c0_33 = arith.constant 0 : index
    %42 = vector.load %arg14[%c0_32, %c0_33] : memref<8x1xf32, #tpu.memory_space<vmem>>, vector<8x1xf32>
    %43 = vector.broadcast %42 : vector<8x1xf32> to vector<8x256xf32>
    %44 = arith.addf %41, %43 : vector<8x256xf32>
    %cst_34 = arith.constant -1.000000e+00 : f32
    %cst_35 = arith.constant 1.000000e+00 : f32
    %45 = vector.broadcast %cst_34 : f32 to vector<8x256xf32>
    %46 = arith.maximumf %45, %44 : vector<8x256xf32>
    %47 = vector.broadcast %cst_35 : f32 to vector<8x256xf32>
    %48 = arith.minimumf %47, %46 : vector<8x256xf32>
    %49 = arith.maximumf %1, %2 : vector<8x256xf32>
    %50 = arith.subf %48, %49 : vector<8x256xf32>
    %51 = arith.mulf %50, %50 : vector<8x256xf32>
    %52 = vector.shape_cast %51 : vector<8x256xf32> to vector<1x8x256xf32>
    %cst_36 = arith.constant dense<0.000000e+00> : vector<1xf32>
    %53 = vector.multi_reduction <add>, %52, %cst_36 [1, 2] : vector<1x8x256xf32> to vector<1xf32>
    %54 = vector.shape_cast %53 : vector<1xf32> to vector<1x1x1xf32>
    %55 = vector.extract %54[0, 0, 0] : f32 from vector<1x1x1xf32>
    %cst_37 = arith.constant 2.048000e+03 : f32
    %56 = arith.divf %55, %cst_37 : f32
    %cst_38 = arith.constant 4.000000e+00 : f32
    %57 = arith.mulf %cst_38, %56 : f32
    %58 = arith.subf %48, %3 : vector<8x256xf32>
    %59 = arith.mulf %58, %58 : vector<8x256xf32>
    %60 = vector.shape_cast %59 : vector<8x256xf32> to vector<1x8x256xf32>
    %cst_39 = arith.constant dense<0.000000e+00> : vector<1xf32>
    %61 = vector.multi_reduction <add>, %60, %cst_39 [1, 2] : vector<1x8x256xf32> to vector<1xf32>
    %62 = vector.shape_cast %61 : vector<1xf32> to vector<1x1x1xf32>
    %63 = vector.extract %62[0, 0, 0] : f32 from vector<1x1x1xf32>
    %cst_40 = arith.constant 2.048000e+03 : f32
    %64 = arith.divf %63, %cst_40 : f32
    %cst_41 = arith.constant 2.000000e+00 : f32
    %65 = arith.mulf %cst_41, %64 : f32
    %c0_42 = arith.constant 0 : index
    %c0_43 = arith.constant 0 : index
    %66 = vector.load %arg3[%c0_42, %c0_43] : memref<2x256xf32, #tpu.memory_space<vmem>>, vector<2x256xf32>
    %67 = vector.extract_strided_slice %66 {offsets = [0, 0], sizes = [1, 256], strides = [1, 1]} : vector<2x256xf32> to vector<1x256xf32>
    %68 = vector.extract_strided_slice %66 {offsets = [1, 0], sizes = [1, 256], strides = [1, 1]} : vector<2x256xf32> to vector<1x256xf32>
    %c16_i32 = arith.constant 16 : i32
    %69 = tpu.dynamic_rotate %1 by %c16_i32 dim 1 : vector<8x256xf32>, i32 -> vector<8x256xf32>
    %70 = arith.subf %1, %69 : vector<8x256xf32>
    %71 = math.absf %70 : vector<8x256xf32>
    %c16_i32_44 = arith.constant 16 : i32
    %72 = tpu.dynamic_rotate %2 by %c16_i32_44 dim 1 : vector<8x256xf32>, i32 -> vector<8x256xf32>
    %73 = arith.subf %2, %72 : vector<8x256xf32>
    %74 = math.absf %73 : vector<8x256xf32>
    %75 = arith.maximumf %71, %74 : vector<8x256xf32>
    %c1_i32 = arith.constant 1 : i32
    %76 = tpu.dynamic_rotate %1 by %c1_i32 dim 1 : vector<8x256xf32>, i32 -> vector<8x256xf32>
    %77 = arith.subf %1, %76 : vector<8x256xf32>
    %78 = math.absf %77 : vector<8x256xf32>
    %c1_i32_45 = arith.constant 1 : i32
    %79 = tpu.dynamic_rotate %2 by %c1_i32_45 dim 1 : vector<8x256xf32>, i32 -> vector<8x256xf32>
    %80 = arith.subf %2, %79 : vector<8x256xf32>
    %81 = math.absf %80 : vector<8x256xf32>
    %82 = arith.maximumf %78, %81 : vector<8x256xf32>
    %c16_i32_46 = arith.constant 16 : i32
    %83 = tpu.dynamic_rotate %48 by %c16_i32_46 dim 1 : vector<8x256xf32>, i32 -> vector<8x256xf32>
    %84 = arith.subf %48, %83 : vector<8x256xf32>
    %85 = math.absf %84 : vector<8x256xf32>
    %86 = arith.subf %85, %75 : vector<8x256xf32>
    %87 = math.absf %86 : vector<8x256xf32>
    %88 = vector.broadcast %67 : vector<1x256xf32> to vector<8x256xf32>
    %89 = arith.mulf %87, %88 : vector<8x256xf32>
    %90 = vector.shape_cast %89 : vector<8x256xf32> to vector<1x8x256xf32>
    %cst_47 = arith.constant dense<0.000000e+00> : vector<1xf32>
    %91 = vector.multi_reduction <add>, %90, %cst_47 [1, 2] : vector<1x8x256xf32> to vector<1xf32>
    %92 = vector.shape_cast %91 : vector<1xf32> to vector<1x1x1xf32>
    %93 = vector.extract %92[0, 0, 0] : f32 from vector<1x1x1xf32>
    %cst_48 = arith.constant 1.920000e+03 : f32
    %94 = arith.divf %93, %cst_48 : f32
    %c1_i32_49 = arith.constant 1 : i32
    %95 = tpu.dynamic_rotate %48 by %c1_i32_49 dim 1 : vector<8x256xf32>, i32 -> vector<8x256xf32>
    %96 = arith.subf %48, %95 : vector<8x256xf32>
    %97 = math.absf %96 : vector<8x256xf32>
    %98 = arith.subf %97, %82 : vector<8x256xf32>
    %99 = math.absf %98 : vector<8x256xf32>
    %100 = vector.broadcast %68 : vector<1x256xf32> to vector<8x256xf32>
    %101 = arith.mulf %99, %100 : vector<8x256xf32>
    %102 = vector.shape_cast %101 : vector<8x256xf32> to vector<1x8x256xf32>
    %cst_50 = arith.constant dense<0.000000e+00> : vector<1xf32>
    %103 = vector.multi_reduction <add>, %102, %cst_50 [1, 2] : vector<1x8x256xf32> to vector<1xf32>
    %104 = vector.shape_cast %103 : vector<1xf32> to vector<1x1x1xf32>
    %105 = vector.extract %104[0, 0, 0] : f32 from vector<1x1x1xf32>
    %cst_51 = arith.constant 1.920000e+03 : f32
    %106 = arith.divf %105, %cst_51 : f32
    %107 = arith.addf %94, %106 : f32
    %cst_52 = arith.constant 5.000000e+00 : f32
    %108 = arith.mulf %cst_52, %107 : f32
    %cst_53 = arith.constant dense<0.000000e+00> : vector<8xf32>
    %109 = vector.multi_reduction <add>, %48, %cst_53 [1] : vector<8x256xf32> to vector<8xf32>
    %110 = vector.shape_cast %109 : vector<8xf32> to vector<8x1xf32>
    %cst_54 = arith.constant 3.906250e-03 : f32
    %111 = vector.broadcast %cst_54 : f32 to vector<8x1xf32>
    %112 = arith.mulf %110, %111 : vector<8x1xf32>
    %cst_55 = arith.constant dense<0.000000e+00> : vector<8xf32>
    %113 = vector.multi_reduction <add>, %1, %cst_55 [1] : vector<8x256xf32> to vector<8xf32>
    %114 = vector.shape_cast %113 : vector<8xf32> to vector<8x1xf32>
    %cst_56 = arith.constant 3.906250e-03 : f32
    %115 = vector.broadcast %cst_56 : f32 to vector<8x1xf32>
    %116 = arith.mulf %114, %115 : vector<8x1xf32>
    %117 = vector.broadcast %112 : vector<8x1xf32> to vector<8x256xf32>
    %118 = arith.subf %48, %117 : vector<8x256xf32>
    %119 = vector.broadcast %116 : vector<8x1xf32> to vector<8x256xf32>
    %120 = arith.subf %1, %119 : vector<8x256xf32>
    %121 = arith.mulf %118, %118 : vector<8x256xf32>
    %cst_57 = arith.constant dense<0.000000e+00> : vector<8xf32>
    %122 = vector.multi_reduction <add>, %121, %cst_57 [1] : vector<8x256xf32> to vector<8xf32>
    %123 = vector.shape_cast %122 : vector<8xf32> to vector<8x1xf32>
    %cst_58 = arith.constant 3.906250e-03 : f32
    %124 = vector.broadcast %cst_58 : f32 to vector<8x1xf32>
    %125 = arith.mulf %123, %124 : vector<8x1xf32>
    %126 = arith.mulf %120, %120 : vector<8x256xf32>
    %cst_59 = arith.constant dense<0.000000e+00> : vector<8xf32>
    %127 = vector.multi_reduction <add>, %126, %cst_59 [1] : vector<8x256xf32> to vector<8xf32>
    %128 = vector.shape_cast %127 : vector<8xf32> to vector<8x1xf32>
    %cst_60 = arith.constant 3.906250e-03 : f32
    %129 = vector.broadcast %cst_60 : f32 to vector<8x1xf32>
    %130 = arith.mulf %128, %129 : vector<8x1xf32>
    %131 = arith.mulf %118, %120 : vector<8x256xf32>
    %cst_61 = arith.constant dense<0.000000e+00> : vector<8xf32>
    %132 = vector.multi_reduction <add>, %131, %cst_61 [1] : vector<8x256xf32> to vector<8xf32>
    %133 = vector.shape_cast %132 : vector<8xf32> to vector<8x1xf32>
    %cst_62 = arith.constant 3.906250e-03 : f32
    %134 = vector.broadcast %cst_62 : f32 to vector<8x1xf32>
    %135 = arith.mulf %133, %134 : vector<8x1xf32>
    %cst_63 = arith.constant 2.000000e+00 : f32
    %136 = vector.broadcast %cst_63 : f32 to vector<8x1xf32>
    %137 = arith.mulf %136, %112 : vector<8x1xf32>
    %138 = arith.mulf %137, %116 : vector<8x1xf32>
    %cst_64 = arith.constant 9.99999974E-5 : f32
    %139 = vector.broadcast %cst_64 : f32 to vector<8x1xf32>
    %140 = arith.addf %138, %139 : vector<8x1xf32>
    %cst_65 = arith.constant 2.000000e+00 : f32
    %141 = vector.broadcast %cst_65 : f32 to vector<8x1xf32>
    %142 = arith.mulf %141, %135 : vector<8x1xf32>
    %cst_66 = arith.constant 8.99999984E-4 : f32
    %143 = vector.broadcast %cst_66 : f32 to vector<8x1xf32>
    %144 = arith.addf %142, %143 : vector<8x1xf32>
    %145 = arith.mulf %140, %144 : vector<8x1xf32>
    %146 = arith.mulf %112, %112 : vector<8x1xf32>
    %147 = arith.mulf %116, %116 : vector<8x1xf32>
    %148 = arith.addf %146, %147 : vector<8x1xf32>
    %cst_67 = arith.constant 9.99999974E-5 : f32
    %149 = vector.broadcast %cst_67 : f32 to vector<8x1xf32>
    %150 = arith.addf %148, %149 : vector<8x1xf32>
    %151 = arith.addf %125, %130 : vector<8x1xf32>
    %cst_68 = arith.constant 8.99999984E-4 : f32
    %152 = vector.broadcast %cst_68 : f32 to vector<8x1xf32>
    %153 = arith.addf %151, %152 : vector<8x1xf32>
    %154 = arith.mulf %150, %153 : vector<8x1xf32>
    %155 = arith.divf %145, %154 : vector<8x1xf32>
    %156 = vector.shape_cast %155 : vector<8x1xf32> to vector<1x8x1xf32>
    %cst_69 = arith.constant dense<0.000000e+00> : vector<1xf32>
    %157 = vector.multi_reduction <add>, %156, %cst_69 [1, 2] : vector<1x8x1xf32> to vector<1xf32>
    %158 = vector.shape_cast %157 : vector<1xf32> to vector<1x1x1xf32>
    %159 = vector.extract %158[0, 0, 0] : f32 from vector<1x1x1xf32>
    %cst_70 = arith.constant 8.000000e+00 : f32
    %160 = arith.divf %159, %cst_70 : f32
    %cst_71 = arith.constant 1.000000e+00 : f32
    %161 = arith.subf %cst_71, %160 : f32
    %cst_72 = arith.constant dense<0.000000e+00> : vector<8xf32>
    %162 = vector.multi_reduction <add>, %48, %cst_72 [1] : vector<8x256xf32> to vector<8xf32>
    %163 = vector.shape_cast %162 : vector<8xf32> to vector<8x1xf32>
    %cst_73 = arith.constant 3.906250e-03 : f32
    %164 = vector.broadcast %cst_73 : f32 to vector<8x1xf32>
    %165 = arith.mulf %163, %164 : vector<8x1xf32>
    %cst_74 = arith.constant dense<0.000000e+00> : vector<8xf32>
    %166 = vector.multi_reduction <add>, %2, %cst_74 [1] : vector<8x256xf32> to vector<8xf32>
    %167 = vector.shape_cast %166 : vector<8xf32> to vector<8x1xf32>
    %cst_75 = arith.constant 3.906250e-03 : f32
    %168 = vector.broadcast %cst_75 : f32 to vector<8x1xf32>
    %169 = arith.mulf %167, %168 : vector<8x1xf32>
    %170 = vector.broadcast %165 : vector<8x1xf32> to vector<8x256xf32>
    %171 = arith.subf %48, %170 : vector<8x256xf32>
    %172 = vector.broadcast %169 : vector<8x1xf32> to vector<8x256xf32>
    %173 = arith.subf %2, %172 : vector<8x256xf32>
    %174 = arith.mulf %171, %171 : vector<8x256xf32>
    %cst_76 = arith.constant dense<0.000000e+00> : vector<8xf32>
    %175 = vector.multi_reduction <add>, %174, %cst_76 [1] : vector<8x256xf32> to vector<8xf32>
    %176 = vector.shape_cast %175 : vector<8xf32> to vector<8x1xf32>
    %cst_77 = arith.constant 3.906250e-03 : f32
    %177 = vector.broadcast %cst_77 : f32 to vector<8x1xf32>
    %178 = arith.mulf %176, %177 : vector<8x1xf32>
    %179 = arith.mulf %173, %173 : vector<8x256xf32>
    %cst_78 = arith.constant dense<0.000000e+00> : vector<8xf32>
    %180 = vector.multi_reduction <add>, %179, %cst_78 [1] : vector<8x256xf32> to vector<8xf32>
    %181 = vector.shape_cast %180 : vector<8xf32> to vector<8x1xf32>
    %cst_79 = arith.constant 3.906250e-03 : f32
    %182 = vector.broadcast %cst_79 : f32 to vector<8x1xf32>
    %183 = arith.mulf %181, %182 : vector<8x1xf32>
    %184 = arith.mulf %171, %173 : vector<8x256xf32>
    %cst_80 = arith.constant dense<0.000000e+00> : vector<8xf32>
    %185 = vector.multi_reduction <add>, %184, %cst_80 [1] : vector<8x256xf32> to vector<8xf32>
    %186 = vector.shape_cast %185 : vector<8xf32> to vector<8x1xf32>
    %cst_81 = arith.constant 3.906250e-03 : f32
    %187 = vector.broadcast %cst_81 : f32 to vector<8x1xf32>
    %188 = arith.mulf %186, %187 : vector<8x1xf32>
    %cst_82 = arith.constant 2.000000e+00 : f32
    %189 = vector.broadcast %cst_82 : f32 to vector<8x1xf32>
    %190 = arith.mulf %189, %165 : vector<8x1xf32>
    %191 = arith.mulf %190, %169 : vector<8x1xf32>
    %cst_83 = arith.constant 9.99999974E-5 : f32
    %192 = vector.broadcast %cst_83 : f32 to vector<8x1xf32>
    %193 = arith.addf %191, %192 : vector<8x1xf32>
    %cst_84 = arith.constant 2.000000e+00 : f32
    %194 = vector.broadcast %cst_84 : f32 to vector<8x1xf32>
    %195 = arith.mulf %194, %188 : vector<8x1xf32>
    %cst_85 = arith.constant 8.99999984E-4 : f32
    %196 = vector.broadcast %cst_85 : f32 to vector<8x1xf32>
    %197 = arith.addf %195, %196 : vector<8x1xf32>
    %198 = arith.mulf %193, %197 : vector<8x1xf32>
    %199 = arith.mulf %165, %165 : vector<8x1xf32>
    %200 = arith.mulf %169, %169 : vector<8x1xf32>
    %201 = arith.addf %199, %200 : vector<8x1xf32>
    %cst_86 = arith.constant 9.99999974E-5 : f32
    %202 = vector.broadcast %cst_86 : f32 to vector<8x1xf32>
    %203 = arith.addf %201, %202 : vector<8x1xf32>
    %204 = arith.addf %178, %183 : vector<8x1xf32>
    %cst_87 = arith.constant 8.99999984E-4 : f32
    %205 = vector.broadcast %cst_87 : f32 to vector<8x1xf32>
    %206 = arith.addf %204, %205 : vector<8x1xf32>
    %207 = arith.mulf %203, %206 : vector<8x1xf32>
    %208 = arith.divf %198, %207 : vector<8x1xf32>
    %209 = vector.shape_cast %208 : vector<8x1xf32> to vector<1x8x1xf32>
    %cst_88 = arith.constant dense<0.000000e+00> : vector<1xf32>
    %210 = vector.multi_reduction <add>, %209, %cst_88 [1, 2] : vector<1x8x1xf32> to vector<1xf32>
    %211 = vector.shape_cast %210 : vector<1xf32> to vector<1x1x1xf32>
    %212 = vector.extract %211[0, 0, 0] : f32 from vector<1x1x1xf32>
    %cst_89 = arith.constant 8.000000e+00 : f32
    %213 = arith.divf %212, %cst_89 : f32
    %cst_90 = arith.constant 1.000000e+00 : f32
    %214 = arith.subf %cst_90, %213 : f32
    %215 = arith.addf %161, %214 : f32
    %216 = arith.addf %57, %108 : f32
    %217 = arith.addf %216, %215 : f32
    %218 = arith.addf %217, %65 : f32
    %219 = vector.broadcast %218 : f32 to vector<8x256xf32>
    %220 = arith.addf %25, %219 : vector<8x256xf32>
    %cst_91 = arith.constant 5.000000e-02 : f32
    %221 = vector.broadcast %cst_91 : f32 to vector<8x256xf32>
    %222 = arith.mulf %220, %221 : vector<8x256xf32>
    %c0_92 = arith.constant 0 : index
    %c0_93 = arith.constant 0 : index
    %223 = vector.load %arg15[%c0_92, %c0_93] : memref<8x256xf32, #tpu.memory_space<vmem>>, vector<8x256xf32>
    tpu.vector_store %arg15[%c0_92, %c0_93], %222 {strides = array<i32>} : memref<8x256xf32, #tpu.memory_space<vmem>>, vector<8x256xf32>,
    return
  }
}

</mosaic_0001>

<bundles_post_ra>
// kernel: tpu_custom_call.1
= control target key start
LH: loop header
LB: loop body
LE: loop exit
PB: predicated region body
PF: predicated region fallthrough
CT: control target
= control target key end

     0   :  { %20 = vsyncpa [#allocation3], 0  ;;  %s1358_s0 = inlined_call_operand.hbm [shape: f32[16,256], index: 0, kind: input, shape index: {}]   ;;  %s1359_s1 = inlined_call_operand.vmem [shape: f32[8,256], index: 1, kind: input, shape index: {}]   ;;  %s1360_s2 = inlined_call_operand.vmem [shape: f32[8,256], index: 2, kind: input, shape index: {}]   ;;  %s1361_s3 = inlined_call_operand.hbm [shape: f32[2,256], index: 3, kind: input, shape index: {}]   ;;  %s1362_s4 = inlined_call_operand.vmem [shape: f32[8,16], index: 4, kind: input, shape index: {}]   ;;  %s1363_s5 = inlined_call_operand.vmem [shape: f32[8,8], index: 5, kind: input, shape index: {}]   ;;  %s1364_s6 = inlined_call_operand.hbm [shape: f32[8,8], index: 6, kind: input, shape index: {}]   ;;  %s1365_s7 = inlined_call_operand.hbm [shape: f32[8,16], index: 7, kind: input, shape index: {}]   ;;  %s1366_s8 = inlined_call_operand.hbm [shape: f32[8,8], index: 8, kind: input, shape index: {}]   ;;  %s1367_s9 = inlined_call_operand.vmem [shape: f32[8,1], index: 9, kind: input, shape index: {}]   ;;  %s1368_s10 = inlined_call_operand.vmem [shape: f32[8,1], index: 10, kind: input, shape index: {}]   ;;  %s1369_s11 = inlined_call_operand.vmem [shape: f32[8,1], index: 11, kind: input, shape index: {}]   ;;  %s1370_s12 = inlined_call_operand.vmem [shape: f32[8,1], index: 12, kind: input, shape index: {}]   ;;  %s1371_s13 = inlined_call_operand.vmem [shape: f32[8,1], index: 13, kind: input, shape index: {}]   ;;  %s1372_s14 = inlined_call_operand.vmem [shape: f32[8,1], index: 14, kind: input, shape index: {}]   ;;  %s1373_s15 = inlined_call_operand.hbm [shape: f32[8,256], index: 15, kind: output, shape index: {}]  }
   0x1   :  { %21 = vsyncpa [#allocation6], 0 }
   0x2   :  { %22 = vsyncpa [#allocation9], 0  ;;  %s46_s20 = sshll.u32 %s1361_s3, 4  ;;  %s47_s20 = int_to_ptr.hbm [resolvable:$true] %s46_s20 }
   0x3   :  { %23 = vsyncpa [#allocation4], 0  ;;  %s984_s21 = smov [#allocation5]   ;;  %s72_s25 = sshll.u32 %s1365_s7, 4  ;;  %s73_s25 = int_to_ptr.hbm [resolvable:$true] %s72_s25 }
   0x4   :  { %s48_s22 = sshll.u32 %s984_s21, 4  ;;  %s985_s26 = smov [#allocation8]   ;;  %s49_s22 = int_to_ptr.vmem [resolvable:$true] %s48_s22 }
   0x5   :  { %51 = dma.hbm_to_vmem [thread:$0]  %s47_s20, 64, %s49_s22, [#allocation6]  }
   0x6   :  { %s74_s27 = sshll.u32 %s985_s26, 4  ;;  %s28_s30 = sshll.u32 %s1358_s0, 4  ;;  %s75_s27 = int_to_ptr.vmem [resolvable:$true] %s74_s27  ;;  %s29_s30 = int_to_ptr.hbm [resolvable:$true] %s28_s30 }
   0x7   :  { %77 = dma.hbm_to_vmem [thread:$0]  %s73_s25, 128, %s75_s27, [#allocation9]  }
   0x8   :  { %s986_s3 = smov [#allocation2]   ;;  %s61_s19 = sshll.u32 %s1364_s6, 4  ;;  %s62_s19 = int_to_ptr.hbm [resolvable:$true] %s61_s19 }
   0x9   :  { %s30_s16 = sshll.u32 %s986_s3, 4  ;;  %s987_s21 = smov 256   ;;  %s31_s16 = int_to_ptr.vmem [resolvable:$true] %s30_s16 }
   0xa   :  { %s988_s7 = smov 16   ;;  %s989_s20 = smov [#allocation7]  }
   0xb   :  { %36 = dma.hbm_to_vmem [thread:$0]  %s29_s30, 512, %s31_s16, [#allocation3], %s987_s21, %s987_s21, %s988_s7  }
   0xc   :  { %s63_s22 = sshll.u32 %s989_s20, 4  ;;  %s83_s0 = sshll.u32 %s1366_s8, 4  ;;  %s64_s22 = int_to_ptr.vmem [resolvable:$true] %s63_s22  ;;  %s84_s0 = int_to_ptr.hbm [resolvable:$true] %s83_s0 }
   0xd   :  { %66 = dma.hbm_to_vmem [thread:$0]  %s62_s19, 128, %s64_s22, [#allocation6]  }
   0xe   :  { %s990_s25 = smov [#allocation10]  }
   0xf   :  { %s85_s26 = sshll.u32 %s990_s25, 4  ;;  %s86_s26 = int_to_ptr.vmem [resolvable:$true] %s85_s26 }
  0x10   :  { %88 = dma.hbm_to_vmem [thread:$0]  %s84_s0, 128, %s86_s26, [#allocation9]  }
  0x11   :  { %976 = dma.done.wait [#allocation3], 512  }
  0x12   :  { %977 = vsyncadd [#allocation3], 4294966784 }
  0x13   :  { %978 = dma.done.wait [#allocation6], 192  }
  0x14   :  { %979 = vsyncadd [#allocation6], 4294967104 }
  0x15   :  { %980 = dma.done.wait [#allocation9], 256  }
  0x16   :  { %981 = vsyncadd [#allocation9], 4294967040  ;;  %v991_v0 = vmov 0   ;;  %v129_v1 = vld [vmem:[%s1367_s9] sm:$0xff]  ;;  %v1105_v5 = vld [vmem:[#allocation2 + $0x10] sm:$0xff]  ;;  %vm193_vm0 = vcmask 130048  }
  0x17   :  { %819 = vset.pattern.permute.xlu0 %v991_v0  ;;  %820 = vset.pattern.permute.xlu1 %v991_v0  ;;  %v237_v2 = vld [vmem:[%s1371_s13] sm:$0xff]  ;;  %v1107_v6 = vld [vmem:[#allocation2 + $0x18] sm:$0xff]  ;;  %v1113_v8 = vld [vmem:[#allocation2 + $0x8] sm:$0xff]  ;;  %vm149_vm1 = vcmask 64512   ;;  %vm659_vm9 = vcmask 7168  }
  0x18   :  { %821 = vset.pattern.permute.xlu2 %v991_v0  ;;  %132 = vperm.xlu0 %819, %v129_v1   ;;  %v137_v3 = vld [vmem:[%s1368_s10] sm:$0xff]  ;;  %v1134_v12 = vld [vmem:[%s1359_s1 + $0x8] sm:$0xff]  ;;  %v680_v35 = vadd.f32 %v1107_v6, %v1105_v5  ;;  %v318_v50 = vld [vmem:[#allocation10] sm:$0xff] }
  0x19   :  { %240 = vperm.xlu1 %820, %v237_v2   ;;  %v295_v4 = vld [vmem:[%s1369_s11] sm:$0xff]  ;;  %211 = vmatpush.msra.mxu2 %v1105_v5  ;;  %v1144_v14 = vld [vmem:[%s1360_s2 + $0x8] sm:$0xff] }
  0x1a   :  { %v1109_v7 = vld [vmem:[#allocation2] sm:$0xff]  ;;  %231 = vmatpush.msra.mxu3 %v1107_v6  ;;  %v317_v36 = vld [vmem:[#allocation8] sm:$0xff] }
  0x1b   :  { %212 = vmatpush.msra.mxu2 %v1109_v7  ;;  %v147_v9 = vld [vmem:[%s1362_s4] sm:$0xff]  ;;  %v605_v37 = vadd.f32 %v1113_v8, %v1109_v7 }
  0x1c   :  { %232 = vmatpush.msra.mxu3 %v1113_v8  ;;  %776 = vmatmul.msk.f32.vlgmr.msra.gmra.mxu2 %vm193_vm0, %v147_v9  ;;  %v1129_v11 = vld [vmem:[%s1359_s1] sm:$0xff] }
  0x1d   :  { %777 = vmatmul.msk.f32.vlgmr.msra.gmra.mxu3 %vm193_vm0, %v147_v9  ;;  %v1139_v13 = vld [vmem:[%s1360_s2] sm:$0xff]  ;;  %s996_s2 = smov [#allocation11]  }
  0x1e   :  { %v148_v22 = vld [vmem:[%s1363_s5] sm:$0xff]  ;;  %s992_s5 = smov 1   ;;  %s760_s23 = sshll.u32 %s996_s2, 4  ;;  %s761_s23 = int_to_ptr.vmem [resolvable:$true] %s760_s23 }
  0x1f   :  { %v303_v23 = vld [vmem:[%s1370_s12] sm:$0xff] }
  0x20   :  { %140 = vperm.xlu0 %819, %v137_v3   ;;  %306 = vperm.xlu2 %821, %v303_v23   ;;  %v405_v24 = vld [vmem:[%s1372_s14] sm:$0xff] }
  0x21   :  { %298 = vperm.xlu1 %820, %v295_v4   ;;  %v245_v34 = vld [vmem:[#allocation7] sm:$0xff] }
  0x28   :  { %470 = vrot.lane.b32.xlu0 %v1113_v8, %s988_s7  ;;  %408 = vperm.xlu2 %821, %v405_v24  }
  0x30   :  { %483 = vrot.lane.b32.xlu0 %v1107_v6, %s988_s7 }
  0x4b   :  { %606 = vadd.xlane.f32.xlu1 %v605_v37 }
  0x51   :  { %681 = vadd.xlane.f32.xlu2 %v680_v35 }
  0x64   :  { %481 = vrot.lane.b32.xlu1 %v1105_v5, %s988_s7 }
  0x69   :  { %468 = vrot.lane.b32.xlu2 %v1109_v7, %s988_s7 }
  0x6c   :  { %495 = vrot.lane.b32.xlu1 %v1113_v8, %s992_s5 }
  0x71   :  { %493 = vrot.lane.b32.xlu2 %v1109_v7, %s992_s5 }
  0x79   :  { %506 = vrot.lane.b32.xlu2 %v1107_v6, %s992_s5 }
  0x7a   :  { %v307_v39 = vpop.permute.xlu2 %306 }
  0x82   :  { %v409_v51 = vpop.permute.xlu2 %408 }
  0x8a   :  { %v133_v10 = vpop.permute.xlu0 %132 }
  0x8b   :  { %v135_v16 = vmul.f32 %v133_v10, %v1129_v11  ;;  %v136_v17 = vmul.f32 %v133_v10, %v1134_v12  ;;  %v241_v31 = vpop.permute.xlu1 %240 }
  0x92   :  { %v141_v15 = vpop.permute.xlu0 %140 }
  0x93   :  { %v143_v18 = vmul.f32 %v141_v15, %v1139_v13  ;;  %v144_v19 = vmul.f32 %v141_v15, %v1144_v14  ;;  %v299_v38 = vpop.permute.xlu1 %298 }
  0x95   :  { %v145_v20 = vadd.f32 %v143_v18, %v135_v16  ;;  %v146_v21 = vadd.f32 %v144_v19, %v136_v17 }
  0x97   :  { %168 = vmatpush.msra.mxu0 %v145_v20  ;;  %188 = vmatpush.msra.mxu1 %v146_v21  ;;  %v301_v42 = vmul.f32 %v299_v38, %v145_v20  ;;  %v302_v43 = vmul.f32 %v299_v38, %v146_v21 }
  0x98   :  { %774 = vmatmul.msk.f32.vlgmr.msra.gmra.mxu0 %vm149_vm1, %v148_v22  ;;  %775 = vmatmul.msk.f32.vlgmr.msra.gmra.mxu1 %vm149_vm1, %v148_v22  ;;  %v472_v22 = vlaneseq }
  0x9a   :  { %v471_v21 = vpop.permute.xlu0 %470  ;;  %v1221_v23 = vand.u32 127, %v472_v22 }
  0x9c   :  { %vm474_vm2 = vcmp.lt.s32.totalorder %v1221_v23, 16  ;;  %vm497_vm3 = vcmp.lt.s32.totalorder %v1221_v23, 1 }
  0x9f   :  { %v214_v25 = vpop.f32.mrf.mxu2 }
  0xa0   :  { %v234_v26 = vpop.f32.mrf.mxu3 }
  0xbe   :  { %v607_v59 = vpop.xlane.xlu1 %606 }
  0xbf   :  { %v1205_v60 = vmul.f32 0.00390625, %v607_v59 }
  0xc1   :  { %v611_v61 = vsub.f32 %v1109_v7, %v1205_v60  ;;  %v612_v62 = vsub.f32 %v1113_v8, %v1205_v60 }
  0xc3   :  { %v619_v63 = vmul.f32 %v611_v61, %v611_v61  ;;  %v620_v0 = vmul.f32 %v612_v62, %v612_v62 }
  0xc4   :  { %v682_v52 = vpop.xlane.xlu2 %681 }
  0xc5   :  { %v1191_v53 = vmul.f32 0.00390625, %v682_v52  ;;  %v621_v1 = vadd.f32 %v620_v0, %v619_v63 }
  0xc7   :  { %v1195_v54 = vsub.f32 %v1105_v5, %v1191_v53  ;;  %v1199_v55 = vsub.f32 %v1107_v6, %v1191_v53  ;;  %622 = vadd.xlane.f32.xlu0 %v621_v1 }
  0xc9   :  { %v686_v56 = vmul.f32 %v1195_v54, %v1195_v54  ;;  %v687_v57 = vmul.f32 %v1199_v55, %v1199_v55 }
  0xcb   :  { %v688_v58 = vadd.f32 %v687_v57, %v686_v56 }
  0xcc   :  { %v469_v24 = vpop.permute.xlu2 %468 }
  0xcd   :  { %689 = vadd.xlane.f32.xlu1 %v688_v58 }
 0x115   :  { %v170_v27 = vpop.f32.mrf.mxu0  ;;  %v190_v28 = vpop.f32.mrf.mxu1 }
 0x116   :  { %v215_v29 = vadd.f32 %v214_v25, %v170_v27  ;;  %v235_v30 = vadd.f32 %v234_v26, %v190_v28  ;;  %v475_v25 = vsel %vm474_vm2, %v469_v24, %v471_v21  ;;  %v476_v26 = vsel %vm474_vm2, %v471_v21, %v469_v24 }
 0x117   :  { %v477_v27 = vsub.f32 %v1109_v7, %v476_v26  ;;  %v478_v28 = vsub.f32 %v1113_v8, %v475_v25 }
 0x118   :  { %v243_v32 = vadd.f32 %v241_v31, %v215_v29  ;;  %v244_v33 = vadd.f32 %v241_v31, %v235_v30  ;;  %v482_v29 = vpop.permute.xlu1 %481  ;;  %v484_v30 = vpop.permute.xlu0 %483 }
 0x119   :  { %v485_v31 = vsel %vm474_vm2, %v482_v29, %v484_v30 }
 0x11a   :  { %264 = vmatpush.msrb.mxu0 %v243_v32  ;;  %284 = vmatpush.msrb.mxu1 %v244_v33  ;;  %v486_v32 = vsel %vm474_vm2, %v484_v30, %v482_v29  ;;  %v1236_v33 = vand.u32 2147483647, %v477_v27 }
 0x11b   :  { %778 = vmatmul.msk.f32.vlgmr.msrb.gmra.mxu0 %vm149_vm1, %v245_v34  ;;  %779 = vmatmul.msk.f32.vlgmr.msrb.gmra.mxu1 %vm149_vm1, %v245_v34  ;;  %v1238_v34 = vand.u32 2147483647, %v478_v28  ;;  %v487_v35 = vsub.f32 %v1105_v5, %v486_v32 }
 0x11c   :  { %379 = vmatpush.msra.mxu0 %v1105_v5  ;;  %399 = vmatpush.msra.mxu1 %v1107_v6 }
 0x11d   :  { %v1244_v37 = vand.u32 2147483647, %v487_v35 }
 0x11e   :  { %380 = vmatpush.msra.mxu0 %v1109_v7  ;;  %400 = vmatpush.msra.mxu1 %v1113_v8 }
 0x123   :  { %784 = vmatmul.msk.f32.vlgmr.msra.gmra.mxu0 %vm193_vm0, %v317_v36  ;;  %785 = vmatmul.msk.f32.vlgmr.msra.gmra.mxu1 %vm193_vm0, %v317_v36  ;;  %v488_v36 = vsub.f32 %v1107_v6, %v485_v31 }
 0x125   :  { %v1246_v38 = vand.u32 2147483647, %v488_v36  ;;  %v1301_v36 = vld [vmem:[#allocation5] sm:$0xf] }
 0x198   :  { %v1179_v40 = vpop.f32.mrf.mxu0  ;;  %v1181_v41 = vpop.f32.mrf.mxu1 }
 0x199   :  { %v309_v44 = vmul.f32 %v307_v39, %v1179_v40  ;;  %v310_v45 = vmul.f32 %v307_v39, %v1181_v41  ;;  %v491_v39 = vmax.f32 %v1236_v33, %v1244_v37 }
 0x19b   :  { %v311_v46 = vsub.f32 %v301_v42, %v309_v44  ;;  %v312_v47 = vsub.f32 %v302_v43, %v310_v45  ;;  %v492_v42 = vmax.f32 %v1238_v34, %v1246_v38  ;;  %v417_v43 = vmax.f32 %v1109_v7, %v1105_v5 }
 0x19c   :  { %v418_v44 = vmax.f32 %v1113_v8, %v1107_v6 }
 0x19d   :  { %v780_v48 = vclamps-f32 %v311_v46, 1.0  ;;  %v781_v49 = vclamps-f32 %v312_v47, 1.0 }
 0x19f   :  { %337 = vmatpush.msrb.mxu2 %v780_v48  ;;  %357 = vmatpush.msrb.mxu3 %v781_v49 }
 0x1a0   :  { %782 = vmatmul.msk.f32.vlgmr.msrb.gmra.mxu2 %vm149_vm1, %v318_v50  ;;  %783 = vmatmul.msk.f32.vlgmr.msrb.gmra.mxu3 %vm149_vm1, %v318_v50  ;;  %v382_v2 = vpop.f32.mrf.mxu0  ;;  %v402_v3 = vpop.f32.mrf.mxu1 }
 0x1a1   :  { %v1258_v50 = vpop.xlane.xlu0 %622 }
 0x223   :  { %v339_v4 = vpop.f32.mrf.mxu2  ;;  %v359_v9 = vpop.f32.mrf.mxu3 }
 0x224   :  { %v383_v10 = vadd.f32 %v382_v2, %v339_v4  ;;  %v403_v15 = vadd.f32 %v402_v3, %v359_v9  ;;  %v496_v3 = vpop.permute.xlu1 %495 }
 0x226   :  { %v411_v16 = vadd.f32 %v409_v51, %v383_v10  ;;  %v412_v17 = vadd.f32 %v409_v51, %v403_v15 }
 0x228   :  { %v1211_v18 = vclamps-f32 %v411_v16, 1.0  ;;  %v1213_v19 = vclamps-f32 %v412_v17, 1.0  ;;  %v494_v17 = vpop.permute.xlu2 %493 }
 0x22a   :  { %516 = vrot.lane.b32.xlu1 %v1211_v18, %s988_s7  ;;  %v601_v20 = vadd.f32 %v1213_v19, %v1211_v18  ;;  %v419_v45 = vsub.f32 %v1211_v18, %v417_v43  ;;  %v420_v46 = vsub.f32 %v1213_v19, %v418_v44  ;;  %v443_v10 = vsub.f32 %v1211_v18, %v1129_v11 }
 0x22b   :  { %v444_v15 = vsub.f32 %v1213_v19, %v1134_v12  ;;  %v498_v11 = vsel %vm497_vm3, %v494_v17, %v496_v3  ;;  %v499_v12 = vsel %vm497_vm3, %v496_v3, %v494_v17 }
 0x22c   :  { %602 = vadd.xlane.f32.xlu0 %v601_v20  ;;  %v421_v47 = vmul.f32 %v419_v45, %v419_v45  ;;  %v422_v48 = vmul.f32 %v420_v46, %v420_v46  ;;  %v500_v25 = vsub.f32 %v1109_v7, %v499_v12  ;;  %v501_v26 = vsub.f32 %v1113_v8, %v498_v11 }
 0x22d   :  { %v531_v46 = vperm.slane %v1301_v36, 0 }
 0x22e   :  { %v423_v49 = vadd.f32 %v422_v48, %v421_v47  ;;  %v1289_v29 = vand.u32 2147483647, %v500_v25  ;;  %v1291_v30 = vand.u32 2147483647, %v501_v26  ;;  %v532_v47 = vperm.slane %v1301_v36, 2 }
 0x230   :  { %v507_v21 = vpop.permute.xlu2 %506 }
 0x232   :  { %560 = vrot.lane.b32.xlu1 %v1213_v19, %s992_s5 }
 0x240   :  { %504 = vrot.lane.b32.xlu0 %v1105_v5, %s992_s5 }
 0x248   :  { %518 = vrot.lane.b32.xlu0 %v1213_v19, %s988_s7 }
 0x25c   :  { %424 = vadd.xlane.f32.xlu1 %v423_v49 }
 0x29f   :  { %v603_v51 = vpop.xlane.xlu0 %602 }
 0x2a0   :  { %v1260_v52 = vmul.f32 0.00390625, %v603_v51 }
 0x2a2   :  { %v609_v56 = vsub.f32 %v1211_v18, %v1260_v52  ;;  %v610_v57 = vsub.f32 %v1213_v19, %v1260_v52 }
 0x2a4   :  { %v625_v58 = vmul.f32 %v611_v61, %v609_v56  ;;  %v626_v59 = vmul.f32 %v612_v62, %v610_v57  ;;  %v613_v63 = vmul.f32 %v609_v56, %v609_v56  ;;  %v614_v0 = vmul.f32 %v610_v57, %v610_v57 }
 0x2a5   :  { %v692_v1 = vmul.f32 %v1195_v54, %v609_v56  ;;  %v693_v2 = vmul.f32 %v1199_v55, %v610_v57  ;;  %v445_v61 = vmul.f32 %v443_v10, %v443_v10  ;;  %v446_v62 = vmul.f32 %v444_v15, %v444_v15  ;;  %v1274_v54 = vpop.xlane.xlu1 %689 }
 0x2a6   :  { %v627_v4 = vadd.f32 %v626_v59, %v625_v58  ;;  %v615_v9 = vadd.f32 %v614_v0, %v613_v63  ;;  %v535_v57 = vperm.slane %v531_v46, 0  ;;  %v536_v58 = vperm.slane %v532_v47, 0 }
 0x2a7   :  { %v1272_v16 = vadd.f32 %v693_v2, %v692_v1  ;;  %v447_v20 = vadd.f32 %v446_v62, %v445_v61  ;;  %v993_v59 = vmov 2048.0   ;;  %v572_v46 = vperm.slane %v1301_v36, 1 }
 0x2a8   :  { %628 = vadd.xlane.f32.xlu0 %v627_v4  ;;  %616 = vadd.xlane.f32.xlu2 %v615_v9  ;;  %822 = vrcp.f32 %v993_v59  ;;  %v573_v47 = vperm.slane %v1301_v36, 3 }
 0x2aa   :  { %v577_v59 = vperm.slane %v573_v47, 1 }
 0x2ad   :  { %v517_v8 = vpop.permute.xlu1 %516 }
 0x2ae   :  { %v823_v4 = vpop.eup %822 }
 0x2af   :  { %v434_v33 = vmul.f32 2048.0, %v823_v4  ;;  %vm438_vm4 = vweird.f32 %v823_v4 }
 0x2b0   :  { %448 = vadd.xlane.f32.xlu0 %v447_v20 }
 0x2b1   :  { %v435_v37 = vsub.f32 1.0, %v434_v33 }
 0x2b2   :  { %v505_v55 = vpop.permute.xlu0 %504 }
 0x2b3   :  { %v508_v22 = vsel %vm497_vm3, %v505_v55, %v507_v21  ;;  %v509_v24 = vsel %vm497_vm3, %v507_v21, %v505_v55  ;;  %v436_v38 = vmul.f32 %v823_v4, %v435_v37  ;;  %v1322_v55 = vmul.f32 %v1260_v52, %v1260_v52 }
 0x2b4   :  { %v510_v27 = vsub.f32 %v1105_v5, %v509_v24  ;;  %v511_v28 = vsub.f32 %v1107_v6, %v508_v22  ;;  %v638_v21 = vmul.f32 %v1205_v60, %v1205_v60  ;;  %v624_v22 = vmul.f32 0.00390625, %v1258_v50 }
 0x2b5   :  { %v561_v9 = vpop.permute.xlu1 %560  ;;  %v437_v61 = vadd.f32 %v823_v4, %v436_v38 }
 0x2b6   :  { %v1293_v31 = vand.u32 2147483647, %v510_v27  ;;  %v1295_v32 = vand.u32 2147483647, %v511_v28  ;;  %v639_v24 = vadd.f32 %v638_v21, %v1322_v55 }
 0x2b7   :  { %v439_v20 = vsel %vm438_vm4, %v823_v4, %v437_v61 }
 0x2b8   :  { %v514_v35 = vmax.f32 %v1289_v29, %v1293_v31  ;;  %v515_v7 = vmax.f32 %v1291_v30, %v1295_v32  ;;  %v640_v27 = vadd.f32 0.0001, %v639_v24 }
 0x2ba   :  { %v519_v5 = vpop.permute.xlu0 %518 }
 0x2bb   :  { %v520_v6 = vsel %vm474_vm2, %v517_v8, %v519_v5  ;;  %v521_v43 = vsel %vm474_vm2, %v519_v5, %v517_v8 }
 0x2bc   :  { %v522_v44 = vsub.f32 %v1211_v18, %v521_v43  ;;  %v523_v45 = vsub.f32 %v1213_v19, %v520_v6 }
 0x2be   :  { %v524_v48 = vand.u32 2147483647, %v522_v44  ;;  %v525_v49 = vand.u32 2147483647, %v523_v45 }
 0x2c0   :  { %v526_v51 = vsub.f32 %v524_v48, %v491_v39  ;;  %v527_v56 = vsub.f32 %v525_v49, %v492_v42  ;;  %558 = vrot.lane.b32.xlu2 %v1211_v18, %s992_s5  ;;  %s762_s5 = sshll.u32 %s1373_s15, 4  ;;  %s763_s5 = int_to_ptr.hbm [resolvable:$true] %s762_s5 }
 0x2c2   :  { %v528_v63 = vand.u32 2147483647, %v526_v51  ;;  %v529_v0 = vand.u32 2147483647, %v527_v56 }
 0x2c4   :  { %v537_v1 = vmul.f32 %v535_v57, %v528_v63  ;;  %v538_v2 = vmul.f32 %v536_v58, %v529_v0  ;;  %v631_v57 = vmul.f32 2.0, %v1260_v52 }
 0x2c6   :  { %v539_v3 = vadd.f32 %v538_v2, %v537_v1  ;;  %v632_v52 = vmul.f32 %v631_v57, %v1205_v60 }
 0x2cf   :  { %v425_v39 = vpop.xlane.xlu1 %424 }
 0x2d0   :  { %v426_v10 = vrot.slane %v425_v39, 4 }
 0x2d2   :  { %v427_v34 = vadd.f32 %v426_v10, %v425_v39 }
 0x2d4   :  { %v428_v42 = vrot.slane %v427_v34, 2 }
 0x2d6   :  { %v429_v15 = vadd.f32 %v428_v42, %v427_v34 }
 0x2d8   :  { %v430_v62 = vrot.slane %v429_v15, 1 }
 0x2da   :  { %v431_v17 = vadd.f32 %v430_v62, %v429_v15  ;;  %v691_v62 = vmul.f32 0.00390625, %v1274_v54  ;;  %v698_v54 = vmul.f32 %v1191_v53, %v631_v57 }
 0x2dc   :  { %788 = vpush %v431_v17  ;;  %v703_v17 = vmul.f32 %v1191_v53, %v1191_v53 }
 0x2dd   :  { %790 = vpush %v439_v20 }
 0x2de   :  { %v704_v21 = vadd.f32 %v703_v17, %v1322_v55 }
 0x2e9   :  { %695 = vadd.xlane.f32.xlu2 %v1272_v16 }
 0x2f1   :  { %540 = vadd.xlane.f32.xlu2 %v539_v3 }
 0x30d   :  { %s789_s12 = spop %788 }
 0x30e   :  { %s791_s14 = spop %790 }
 0x30f   :  { %s441_s3 = smul.f32 %s791_s14, %s789_s12 }
 0x311   :  { %s442_s13 = smul.f32 4.0, %s441_s3 }
 0x31b   :  { %v617_v11 = vpop.xlane.xlu2 %616  ;;  %v629_v12 = vpop.xlane.xlu0 %628 }
 0x31c   :  { %v618_v25 = vmul.f32 0.00390625, %v617_v11  ;;  %v630_v48 = vmul.f32 0.00390625, %v629_v12  ;;  %v705_v12 = vadd.f32 0.0001, %v704_v21 }
 0x31e   :  { %v641_v26 = vadd.f32 %v624_v22, %v618_v25  ;;  %v634_v0 = vmul.f32 2.0, %v630_v48  ;;  %v706_v20 = vadd.f32 %v691_v62, %v618_v25 }
 0x320   :  { %v642_v28 = vadd.f32 0.0009, %v641_v26  ;;  %v635_v29 = vadd.f32 0.0009, %v634_v0  ;;  %v707_v11 = vadd.f32 0.0009, %v706_v20 }
 0x322   :  { %v643_v8 = vmul.f32 %v642_v28, %v640_v27  ;;  %v708_v22 = vmul.f32 %v707_v11, %v705_v12  ;;  %v994_v28 = vmov 1920.0  }
 0x323   :  { %v559_v16 = vpop.permute.xlu2 %558  ;;  %v449_v5 = vpop.xlane.xlu0 %448 }
 0x324   :  { %824 = vrcp.f32 %v643_v8  ;;  %v562_v6 = vsel %vm497_vm3, %v559_v16, %v561_v9  ;;  %v563_v43 = vsel %vm497_vm3, %v561_v9, %v559_v16  ;;  %v450_v44 = vrot.slane %v449_v5, 4 }
 0x325   :  { %v564_v45 = vsub.f32 %v1211_v18, %v563_v43  ;;  %v565_v50 = vsub.f32 %v1213_v19, %v562_v6  ;;  %v576_v19 = vperm.slane %v572_v46, 1  ;;  %v653_v32 = vand.u32 2147483647, %v643_v8 }
 0x326   :  { %v451_v49 = vadd.f32 %v450_v44, %v449_v5  ;;  %vm649_vm6 = vweird.f32 %v643_v8  ;;  %826 = vrcp.f32 %v708_v22  ;;  %v720_v25 = vand.u32 2147483648, %v708_v22 }
 0x327   :  { %v566_v51 = vand.u32 2147483647, %v564_v45  ;;  %v567_v56 = vand.u32 2147483647, %v565_v50  ;;  %vm654_vm8 = vcmp.eq.f32.partialorder %v653_v32, 8.507059e+37  ;;  %828 = vrcp.f32 %v994_v28 }
 0x328   :  { %v452_v58 = vrot.slane %v451_v49, 2  ;;  %vm714_vm11 = vweird.f32 %v708_v22  ;;  %v718_v55 = vand.u32 2147483647, %v708_v22  ;;  %v699_v50 = vadd.f32 0.0001, %v698_v54 }
 0x329   :  { %v568_v23 = vsub.f32 %v566_v51, %v514_v35  ;;  %v569_v18 = vsub.f32 %v567_v56, %v515_v7  ;;  %v655_v35 = vand.u32 2147483648, %v643_v8  ;;  %v633_v7 = vadd.f32 0.0001, %v632_v52 }
 0x32a   :  { %v825_v63 = vpop.eup %824  ;;  %v453_v36 = vadd.f32 %v452_v58, %v451_v49  ;;  %v721_v48 = vor.u32 1.1754944e-38, %v720_v25  ;;  %vm719_vm13 = vcmp.eq.f32.partialorder %v718_v55, 8.507059e+37 }
 0x32b   :  { %v570_v1 = vand.u32 2147483647, %v568_v23  ;;  %v571_v2 = vand.u32 2147483647, %v569_v18  ;;  %v645_v3 = vmul.f32 %v825_v63, %v643_v8  ;;  %vm650_vm5 = vweird.f32 %v825_v63 }
 0x32c   :  { %v454_v4 = vrot.slane %v453_v36, 1  ;;  %vm651_vm7 = vmor %vm649_vm6, %vm650_vm5  ;;  %v656_v34 = vor.u32 1.1754944e-38, %v655_v35  ;;  %v636_v38 = vmul.f32 %v635_v29, %v633_v7  ;;  %v827_v24 = vpop.eup %826 }
 0x32d   :  { %v578_v9 = vmul.f32 %v576_v19, %v570_v1  ;;  %v579_v33 = vmul.f32 %v577_v59, %v571_v2  ;;  %v646_v37 = vsub.f32 1.0, %v645_v3  ;;  %v710_v26 = vmul.f32 %v827_v24, %v708_v22  ;;  %v829_v16 = vpop.eup %828 }
 0x32e   :  { %v455_v31 = vadd.f32 %v454_v4, %v453_v36  ;;  %vm715_vm10 = vweird.f32 %v827_v24  ;;  %v550_v45 = vmul.f32 1920.0, %v829_v16  ;;  %vm554_vm14 = vweird.f32 %v829_v16 }
 0x32f   :  { %v580_v39 = vadd.f32 %v579_v33, %v578_v9  ;;  %v647_v30 = vmul.f32 %v825_v63, %v646_v37  ;;  %v711_v27 = vsub.f32 1.0, %v710_v26  ;;  %vm716_vm12 = vmor %vm714_vm11, %vm715_vm10  ;;  %v995_v3 = vmov 8.0  }
 0x330   :  { %792 = vpush %v455_v31  ;;  %v551_v51 = vsub.f32 1.0, %v550_v45  ;;  %830 = vrcp.f32 %v995_v3  ;;  %v289_v26 = vsub.f32 %v1179_v40, %v1139_v13 }
 0x331   :  { %581 = vadd.xlane.f32.xlu1 %v580_v39  ;;  %v648_v10 = vadd.f32 %v825_v63, %v647_v30  ;;  %v712_v8 = vmul.f32 %v827_v24, %v711_v27  ;;  %v290_v27 = vsub.f32 %v1181_v41, %v1144_v14 }
 0x332   :  { %v552_v19 = vmul.f32 %v829_v16, %v551_v51  ;;  %v291_v28 = vmul.f32 %v289_v26, %v289_v26 }
 0x333   :  { %v652_v42 = vsel %vm651_vm7, %v825_v63, %v648_v10  ;;  %v713_v43 = vadd.f32 %v827_v24, %v712_v8  ;;  %v292_v8 = vmul.f32 %v290_v27, %v290_v27 }
 0x334   :  { %v657_v60 = vsel %vm654_vm8, %v656_v34, %v652_v42  ;;  %v553_v0 = vadd.f32 %v829_v16, %v552_v19 }
 0x335   :  { %v658_v15 = vmul.f32 %v657_v60, %v636_v38  ;;  %v717_v47 = vsel %vm716_vm12, %v827_v24, %v713_v43 }
 0x336   :  { %v722_v58 = vsel %vm719_vm13, %v721_v48, %v717_v47  ;;  %v555_v2 = vsel %vm554_vm14, %v829_v16, %v553_v0  ;;  %v831_v4 = vpop.eup %830  ;;  %v293_v16 = vmul.f32 8.0, %v291_v28 }
 0x337   :  { %v660_v61 = vsel %vm659_vm9, %v658_v15, 0.0  ;;  %v671_v33 = vmul.f32 8.0, %v831_v4  ;;  %vm675_vm15 = vweird.f32 %v831_v4 }
 0x338   :  { %661 = vadd.xlane.f32.xlu0 %v660_v61 }
 0x339   :  { %v672_v31 = vsub.f32 1.0, %v671_v33 }
 0x33b   :  { %v673_v10 = vmul.f32 %v831_v4, %v672_v31 }
 0x33d   :  { %v674_v60 = vadd.f32 %v831_v4, %v673_v10 }
 0x33f   :  { %v676_v62 = vsel %vm675_vm15, %v831_v4, %v674_v60 }
 0x35c   :  { %v696_v5 = vpop.xlane.xlu2 %695 }
 0x35d   :  { %v697_v6 = vmul.f32 0.00390625, %v696_v5  ;;  %v294_v5 = vmul.f32 8.0, %v292_v8 }
 0x35f   :  { %v700_v44 = vmul.f32 2.0, %v697_v6 }
 0x361   :  { %v701_v46 = vadd.f32 0.0009, %v700_v44  ;;  %s793_s7 = spop %792 }
 0x362   :  { %s465_s18 = smul.f32 %s793_s7, %s791_s14 }
 0x363   :  { %v702_v49 = vmul.f32 %v701_v46, %v699_v50 }
 0x364   :  { %v541_v56 = vpop.xlane.xlu2 %540  ;;  %s466_s20 = smul.f32 2.0, %s465_s18 }
 0x365   :  { %v542_v23 = vrot.slane %v541_v56, 4  ;;  %v723_v53 = vmul.f32 %v722_v58, %v702_v49 }
 0x367   :  { %v543_v57 = vadd.f32 %v542_v23, %v541_v56  ;;  %v724_v18 = vsel %vm659_vm9, %v723_v53, 0.0 }
 0x368   :  { %725 = vadd.xlane.f32.xlu2 %v724_v18 }
 0x369   :  { %v544_v59 = vrot.slane %v543_v57, 2 }
 0x36b   :  { %v545_v63 = vadd.f32 %v544_v59, %v543_v57 }
 0x36d   :  { %v546_v36 = vrot.slane %v545_v63, 1 }
 0x36f   :  { %v547_v1 = vadd.f32 %v546_v36, %v545_v63 }
 0x371   :  { %794 = vpush %v547_v1 }
 0x372   :  { %796 = vpush %v555_v2 }
 0x3a2   :  { %s795_s25 = spop %794 }
 0x3a3   :  { %s797_s26 = spop %796 }
 0x3a4   :  { %v582_v52 = vpop.xlane.xlu1 %581  ;;  %s557_s28 = smul.f32 %s797_s26, %s795_s25 }
 0x3a5   :  { %v583_v9 = vrot.slane %v582_v52, 4 }
 0x3a7   :  { %v584_v37 = vadd.f32 %v583_v9, %v582_v52 }
 0x3a9   :  { %v585_v29 = vrot.slane %v584_v37, 2 }
 0x3ab   :  { %v586_v35 = vadd.f32 %v585_v29, %v584_v37  ;;  %v662_v39 = vpop.xlane.xlu0 %661 }
 0x3ac   :  { %v663_v30 = vrot.slane %v662_v39, 4 }
 0x3ad   :  { %v587_v32 = vrot.slane %v586_v35, 1 }
 0x3ae   :  { %v664_v7 = vadd.f32 %v663_v30, %v662_v39 }
 0x3af   :  { %v588_v34 = vadd.f32 %v587_v32, %v586_v35 }
 0x3b0   :  { %v665_v38 = vrot.slane %v664_v7, 2 }
 0x3b1   :  { %798 = vpush %v588_v34 }
 0x3b2   :  { %v666_v42 = vadd.f32 %v665_v38, %v664_v7 }
 0x3b4   :  { %v667_v15 = vrot.slane %v666_v42, 1 }
 0x3b6   :  { %v668_v61 = vadd.f32 %v667_v15, %v666_v42 }
 0x3b8   :  { %800 = vpush %v668_v61 }
 0x3b9   :  { %802 = vpush %v676_v62 }
 0x3db   :  { %v726_v17 = vpop.xlane.xlu2 %725 }
 0x3dc   :  { %v727_v20 = vrot.slane %v726_v17, 4 }
 0x3de   :  { %v728_v21 = vadd.f32 %v727_v20, %v726_v17 }
 0x3e0   :  { %v729_v11 = vrot.slane %v728_v21, 2 }
 0x3e2   :  { %v730_v12 = vadd.f32 %v729_v11, %v728_v21  ;;  %s799_s6 = spop %798 }
 0x3e3   :  { %s598_s27 = smul.f32 %s799_s6, %s797_s26 }
 0x3e4   :  { %v731_v22 = vrot.slane %v730_v12, 1 }
 0x3e5   :  { %s599_s30 = sadd.f32 %s598_s27, %s557_s28 }
 0x3e6   :  { %v732_v24 = vadd.f32 %v731_v22, %v730_v12 }
 0x3e7   :  { %s600_s9 = smul.f32 5.0, %s599_s30 }
 0x3e8   :  { %804 = vpush %v732_v24 }
 0x3e9   :  { %s801_s8 = spop %800  ;;  %s745_s19 = sadd.f32 %s600_s9, %s442_s13 }
 0x3ea   :  { %s803_s29 = spop %802 }
 0x3eb   :  { %s678_s16 = smul.f32 %s803_s29, %s801_s8 }
 0x3ed   :  { %s679_s17 = ssub.f32 1.0, %s678_s16 }
 0x419   :  { %s805_s10 = spop %804 }
 0x41a   :  { %s742_s11 = smul.f32 %s805_s10, %s803_s29 }
 0x41c   :  { %s743_s4 = ssub.f32 1.0, %s742_s11 }
 0x41e   :  { %s744_s21 = sadd.f32 %s743_s4, %s679_s17 }
 0x420   :  { %s746_s1 = sadd.f32 %s745_s19, %s744_s21 }
 0x422   :  { %s747_s22 = sadd.f32 %s746_s1, %s466_s20 }
 0x424   :  { %v748_v54 = vstv %s747_s22 }
 0x425   :  { %v749_v6 = vadd.f32 %v748_v54, %v293_v16  ;;  %v750_v43 = vadd.f32 %v748_v54, %v294_v5 }
 0x427   :  { %v751_v13 = vmul.f32 0.05, %v749_v6  ;;  %v752_v14 = vmul.f32 0.05, %v750_v43 }
 0x429   :  { %753 = vst [vmem:[#allocation11] sm:$0xff] %v751_v13 }
 0x42a   :  { %754 = vst [vmem:[#allocation11 + $0x8] sm:$0xff] %v752_v14 }
 0x42b   :  { %765 = dma.vmem_to_hbm [thread:$0]  %s761_s23, 256, %s763_s5, [#allocation4]  }
 0x42c   :  { %982 = dma.done.wait [#allocation4], 256  }
 0x42d   :  { %983 = vsyncadd [#allocation4], 4294967040 }
 0x42e   :  { %770 = vsyncpa [#allocation3], 1 }
 0x42f   :  { %771 = vsyncpa [#allocation6], 1 }
 0x430   :  { %772 = vsyncpa [#allocation9], 1 }
 0x431   :  { %773 = vsyncpa [#allocation4], 1 }

</bundles_post_ra>
